<compile_context>
chip_gen: v7x
topology: tpu7x:2x2x1
jax: 0.10.0
libtpu: 0.0.40
codegen_flags: <defaults>
</compile_context>

<pallas_src>
import jax
import jax.numpy as jnp
from jax.experimental import pallas as pl
from jax.experimental.pallas import tpu as pltpu


def _cdiv(a, b):
    return -(-a // b)


def _round_up(n, m):
    return _cdiv(n, m) * m


def _mlp_kernel(x_ref, w1_ref, b1_ref, w2_ref, b2_ref, o_ref):
    # Hoist bias reads (broadcast happens once per grid step).
    b1 = b1_ref[...]                                   # (1, Hpad)   f32
    b2 = b2_ref[...]                                   # (1, out)    f32

    # fc1 on the MXU with f32 accumulation; bias + ReLU in f32 (safe on v5e).
    h = jnp.dot(x_ref[...], w1_ref[...], preferred_element_type=jnp.float32)
    h = jnp.maximum(h + b1, 0.0)

    # Dropout(0.5) in eval mode == identity.

    # fc2: cast activations to the weight dtype (no-op in f32, native-rate MXU in bf16).
    h = h.astype(w2_ref.dtype)
    y = jnp.dot(h, w2_ref[...], preferred_element_type=jnp.float32)
    o_ref[...] = (y + b2).astype(o_ref.dtype)


def net_without_re(x, w1, b1, w2, b2, *, compute_dtype=jnp.float32,
                   out_dtype=None, vmem_budget_bytes=36 * 1024 * 1024):
    """x: (B, input_size); w1: (input_size, 32); b1: (1, 32);
       w2: (32, output_size); b2: (1, output_size).
       Returns (B, output_size) in `out_dtype` (defaults to compute_dtype)."""
    batch, in_size = x.shape
    hidden, out_size = w2.shape
    out_dtype = compute_dtype if out_dtype is None else out_dtype

    dsize_in = jnp.dtype(compute_dtype).itemsize
    dsize_out = jnp.dtype(out_dtype).itemsize

    # ---- hidden 32 -> 128: zero-pad (ReLU(0)=0; zero w2 rows add nothing) ----
    h_pad = _round_up(hidden, 128)
    if h_pad != hidden:
        w1 = jnp.pad(w1, ((0, 0), (0, h_pad - hidden)))
        b1 = jnp.pad(b1, ((0, 0), (0, h_pad - hidden)))
        w2 = jnp.pad(w2, ((0, h_pad - hidden), (0, 0)))

    # ---- dtypes: optionally bf16 for the mem-bound x/weight DMA & MXU --------
    x = x.astype(compute_dtype)
    w1 = w1.astype(compute_dtype)
    w2 = w2.astype(compute_dtype)
    b1 = b1.astype(jnp.float32)
    b2 = b2.astype(jnp.float32)

    # ---- batch: pad only to the sublane granule, size tb from the VMEM budget
    granule = 16 if jnp.dtype(compute_dtype) == jnp.dtype(jnp.bfloat16) else 8
    b_pad = _round_up(batch, granule)

    weight_bytes = ((in_size * h_pad + h_pad * out_size) * dsize_in
                    + (h_pad + out_size) * 4)
    per_row_bytes = (2 * in_size * dsize_in        # double-buffered x tile
                     + 2 * out_size * dsize_out    # double-buffered out tile
                     + 2 * h_pad * 4 + out_size * 4)  # f32 intermediates
    tb_cap = max(granule, (vmem_budget_bytes - weight_bytes) // per_row_bytes)
    tb_cap = max(granule, (tb_cap // granule) * granule)

    # >= 2 balanced tiles when the batch allows, so ("parallel",) can use both
    # TensorCores on v7x (a cheap no-op on single-TC v5e/v6e).
    min_tiles = 2 if b_pad >= 2 * granule else 1
    n_tiles = max(min_tiles, _cdiv(b_pad, tb_cap))
    n_tiles = max(1, min(n_tiles, b_pad // granule))
    tb = _round_up(_cdiv(b_pad, n_tiles), granule)
    b_full = _round_up(b_pad, tb)
    if b_full != batch:
        x = jnp.pad(x, ((0, b_full - batch), (0, 0)))   # at most a few granule rows

    grid = (b_full // tb,)

    cost = pl.CostEstimate(
        flops=2 * b_full * (in_size * h_pad + h_pad * out_size),
        transcendentals=0,
        bytes_accessed=(b_full * in_size * dsize_in        # x
                        + in_size * h_pad * dsize_in       # w1
                        + h_pad * out_size * dsize_in      # w2
                        + (h_pad + out_size) * 4           # biases
                        + b_full * out_size * dsize_out),  # out
    )

    out = pl.pallas_call(
        _mlp_kernel,
        out_shape=jax.ShapeDtypeStruct((b_full, out_size), out_dtype),
        grid=grid,
        in_specs=[
            pl.BlockSpec((tb, in_size), lambda i: (i, 0)),      # x: streamed over batch
            pl.BlockSpec((in_size, h_pad), lambda i: (0, 0)),   # w1: VMEM-resident
            pl.BlockSpec((1, h_pad), lambda i: (0, 0)),         # b1: VMEM-resident
            pl.BlockSpec((h_pad, out_size), lambda i: (0, 0)),  # w2: VMEM-resident
            pl.BlockSpec((1, out_size), lambda i: (0, 0)),      # b2: VMEM-resident
        ],
        out_specs=pl.BlockSpec((tb, out_size), lambda i: (i, 0)),  # no lane padding
        compiler_params=pltpu.CompilerParams(
            dimension_semantics=("parallel",),
            vmem_limit_bytes=min(vmem_budget_bytes + 16 * 1024 * 1024,
                                 100 * 1024 * 1024),
        ),
        cost_estimate=cost,
    )(x, w1, b1, w2, b2)

    return out[:batch] if b_full != batch else out


def init_params(key, input_size, output_size, hidden=32):
    """Deterministic init mimicking PyTorch nn.Linear default
    (uniform(-1/sqrt(fan_in), 1/sqrt(fan_in))); weights stored pre-transposed."""
    k1, k2, k3, k4 = jax.random.split(key, 4)
    bound1 = 1.0 / jnp.sqrt(jnp.float32(input_size))
    bound2 = 1.0 / jnp.sqrt(jnp.float32(hidden))
    w1 = jax.random.uniform(k1, (input_size, hidden), jnp.float32, -bound1, bound1)
    b1 = jax.random.uniform(k2, (1, hidden), jnp.float32, -bound1, bound1)
    w2 = jax.random.uniform(k3, (hidden, output_size), jnp.float32, -bound2, bound2)
    b2 = jax.random.uniform(k4, (1, output_size), jnp.float32, -bound2, bound2)
    return w1, b1, w2, b2


def reference(x, w1, b1, w2, b2):
    h = jnp.maximum(x @ w1 + b1, 0.0)
    return h @ w2 + b2


if __name__ == "__main__":
    key = jax.random.PRNGKey(0)
    k_x, k_p = jax.random.split(key)

    batch, input_size, output_size = 8, 64, 16
    x = jax.random.normal(k_x, (batch, input_size), jnp.float32)
    w1, b1, w2, b2 = init_params(k_p, input_size, output_size)

    ref = reference(x, w1, b1, w2, b2)

    # f32 path: bitwise-faithful to the PyTorch forward (eval-mode dropout).
    out = jax.block_until_ready(net_without_re(x, w1, b1, w2, b2))
    assert out.shape == (batch, output_size)
    assert out.dtype == jnp.float32
    assert jnp.allclose(out, ref, atol=1e-5, rtol=1e-5), "f32 mismatch vs reference"

    # bf16 DMA/MXU/output path (f32 accumulation + f32 epilogue): mem-bound option.
    out_bf16 = jax.block_until_ready(
        net_without_re(x, w1, b1, w2, b2, compute_dtype=jnp.bfloat16))
    assert out_bf16.shape == (batch, output_size)
    assert out_bf16.dtype == jnp.bfloat16
    assert jnp.allclose(out_bf16.astype(jnp.float32), ref, atol=5e-2, rtol=5e-2), \
        "bf16 mismatch vs reference"

    print("KERNEL_OK")
</pallas_src>

<mosaic_0001>
module attributes {stable_mosaic.version = 11 : i64} {
  func.func @_mlp_kernel(%arg0: i32, %arg1: memref<8x64xf32, #tpu.memory_space<vmem>>, %arg2: memref<64x128xf32, #tpu.memory_space<vmem>>, %arg3: memref<1x128xf32, #tpu.memory_space<vmem>>, %arg4: memref<128x16xf32, #tpu.memory_space<vmem>>, %arg5: memref<1x16xf32, #tpu.memory_space<vmem>>, %arg6: memref<8x16xf32, #tpu.memory_space<vmem>>) attributes {dimension_semantics = [#tpu.dimension_semantics<parallel>], iteration_bounds = array<i64: 1>, scalar_prefetch = 0 : i64, scratch_operands = 0 : i64, tpu.core_type = #tpu.core_type<tc>, window_params = [{transform_indices = @transform_0, window_bounds = array<i64: 8, 64>}, {pipeline_mode = #tpu.pipeline_mode<synchronous>, transform_indices = @transform_1, window_bounds = array<i64: 64, 128>}, {pipeline_mode = #tpu.pipeline_mode<synchronous>, transform_indices = @transform_2, window_bounds = array<i64: 1, 128>}, {pipeline_mode = #tpu.pipeline_mode<synchronous>, transform_indices = @transform_3, window_bounds = array<i64: 128, 16>}, {pipeline_mode = #tpu.pipeline_mode<synchronous>, transform_indices = @transform_4, window_bounds = array<i64: 1, 16>}, {transform_indices = @transform_5, window_bounds = array<i64: 8, 16>}]} {
    %c0 = arith.constant 0 : index
    %c0_0 = arith.constant 0 : index
    %0 = vector.load %arg3[%c0, %c0_0] : memref<1x128xf32, #tpu.memory_space<vmem>>, vector<1x128xf32>
    %c0_1 = arith.constant 0 : index
    %c0_2 = arith.constant 0 : index
    %1 = vector.load %arg5[%c0_1, %c0_2] : memref<1x16xf32, #tpu.memory_space<vmem>>, vector<1x16xf32>
    %c0_3 = arith.constant 0 : index
    %c0_4 = arith.constant 0 : index
    %2 = vector.load %arg1[%c0_3, %c0_4] : memref<8x64xf32, #tpu.memory_space<vmem>>, vector<8x64xf32>
    %c0_5 = arith.constant 0 : index
    %c0_6 = arith.constant 0 : index
    %3 = vector.load %arg2[%c0_5, %c0_6] : memref<64x128xf32, #tpu.memory_space<vmem>>, vector<64x128xf32>
    %cst = arith.constant dense<0.000000e+00> : vector<8x128xf32>
    %4 = tpu.matmul %2, %3, %cst {dimension_numbers = #tpu.dot_dimension_numbers<[1], [0], [0], [1], [0, 0, 1, 1], [], []>} : vector<8x64xf32>, vector<64x128xf32>, vector<8x128xf32> -> vector<8x128xf32>
    %5 = vector.broadcast %0 : vector<1x128xf32> to vector<8x128xf32>
    %6 = arith.addf %4, %5 : vector<8x128xf32>
    %cst_7 = arith.constant 0.000000e+00 : f32
    %7 = vector.broadcast %cst_7 : f32 to vector<8x128xf32>
    %8 = arith.maximumf %6, %7 : vector<8x128xf32>
    %c0_8 = arith.constant 0 : index
    %c0_9 = arith.constant 0 : index
    %9 = vector.load %arg4[%c0_8, %c0_9] : memref<128x16xf32, #tpu.memory_space<vmem>>, vector<128x16xf32>
    %cst_10 = arith.constant dense<0.000000e+00> : vector<8x16xf32>
    %10 = tpu.matmul %8, %9, %cst_10 {dimension_numbers = #tpu.dot_dimension_numbers<[1], [0], [0], [1], [0, 0, 1, 1], [], []>} : vector<8x128xf32>, vector<128x16xf32>, vector<8x16xf32> -> vector<8x16xf32>
    %11 = vector.broadcast %1 : vector<1x16xf32> to vector<8x16xf32>
    %12 = arith.addf %10, %11 : vector<8x16xf32>
    %c0_11 = arith.constant 0 : index
    %c0_12 = arith.constant 0 : index
    %13 = vector.load %arg6[%c0_11, %c0_12] : memref<8x16xf32, #tpu.memory_space<vmem>>, vector<8x16xf32>
    tpu.vector_store %arg6[%c0_11, %c0_12], %12 {strides = array<i32>} : memref<8x16xf32, #tpu.memory_space<vmem>>, vector<8x16xf32>,
    return
  }
  func.func @transform_0(%arg0: i32) -> (i32, i32) {
    %c0_i32 = arith.constant 0 : i32
    %c0_i32_0 = arith.constant 0 : i32
    return %arg0, %c0_i32 : i32, i32
  }
  func.func @transform_1(%arg0: i32) -> (i32, i32) {
    %c0_i32 = arith.constant 0 : i32
    %c0_i32_0 = arith.constant 0 : i32
    %c0_i32_1 = arith.constant 0 : i32
    return %c0_i32, %c0_i32_0 : i32, i32
  }
  func.func @transform_2(%arg0: i32) -> (i32, i32) {
    %c0_i32 = arith.constant 0 : i32
    %c0_i32_0 = arith.constant 0 : i32
    %c0_i32_1 = arith.constant 0 : i32
    return %c0_i32, %c0_i32_0 : i32, i32
  }
  func.func @transform_3(%arg0: i32) -> (i32, i32) {
    %c0_i32 = arith.constant 0 : i32
    %c0_i32_0 = arith.constant 0 : i32
    %c0_i32_1 = arith.constant 0 : i32
    return %c0_i32, %c0_i32_0 : i32, i32
  }
  func.func @transform_4(%arg0: i32) -> (i32, i32) {
    %c0_i32 = arith.constant 0 : i32
    %c0_i32_0 = arith.constant 0 : i32
    %c0_i32_1 = arith.constant 0 : i32
    return %c0_i32, %c0_i32_0 : i32, i32
  }
  func.func @transform_5(%arg0: i32) -> (i32, i32) {
    %c0_i32 = arith.constant 0 : i32
    %c0_i32_0 = arith.constant 0 : i32
    return %arg0, %c0_i32 : i32, i32
  }
}

</mosaic_0001>

<bundles_post_ra>
// kernel: tpu_custom_call.1
= control target key start
LH: loop header
LB: loop body
LE: loop exit
PB: predicated region body
PF: predicated region fallthrough
CT: control target
= control target key end

     0   :  { %v368_v3 = vmov 0.0|0.0   ;;  %vm369_vm0 = vmmov 0   ;;  %v370_v6 = vmov 0.0   ;;  %s495_s0 = inlined_call_operand.vmem [shape: f32[8,64], index: 0, kind: input, shape index: {}]   ;;  %s496_s1 = inlined_call_operand.vmem [shape: f32[64,128], index: 1, kind: input, shape index: {}]   ;;  %s497_s2 = inlined_call_operand.vmem [shape: f32[1,128], index: 2, kind: input, shape index: {}]   ;;  %s498_s3 = inlined_call_operand.vmem [shape: f32[128,16], index: 3, kind: input, shape index: {}]   ;;  %s499_s4 = inlined_call_operand.vmem [shape: f32[1,16], index: 4, kind: input, shape index: {}]   ;;  %s500_s5 = inlined_call_operand.hbm [shape: f32[8,16], index: 5, kind: output, shape index: {}]  }
   0x1   :  { %v24_v0 = vld [vmem:[%s496_s1] sm:$0xff]  ;;  %v25_v1 = vld [vmem:[%s496_s1 + $0x8] sm:$0xff]  ;;  %v26_v2 = vld [vmem:[%s496_s1 + $0x10] sm:$0xff]  ;;  %304 = vmatprep.subr.bf16.mxu0 %v368_v3  ;;  %266 = vmatprep.mubr.msk.f32.mxu0 %vm369_vm0, %v370_v6 }
   0x2   :  { %v305_v4 = vpack.c.bf16 %v25_v1, %v24_v0  ;;  %v27_v5 = vld [vmem:[%s496_s1 + $0x18] sm:$0xff]  ;;  %316 = vmatprep.subr.bf16.mxu1 %v368_v3  ;;  %301 = vmatprep.mubr.msk.f32.mxu1 %vm369_vm0, %v370_v6  ;;  %v113_v8 = vld [vmem:[%s498_s3] sm:$0xff]  ;;  %v114_v9 = vld [vmem:[%s498_s3 + $0x8] sm:$0xff] }
   0x3   :  { %v308_v7 = vpack.c.bf16 %v27_v5, %v26_v2  ;;  %v115_v10 = vld [vmem:[%s498_s3 + $0x10] sm:$0xff]  ;;  %v28_v11 = vld [vmem:[%s496_s1 + $0x20] sm:$0xff]  ;;  %v29_v12 = vld [vmem:[%s496_s1 + $0x28] sm:$0xff]  ;;  %v317_v13 = vpack.c.bf16 %v114_v9, %v113_v8 }
   0x4   :  { %306 = vmatpush3.bf16.msra.mxu0 %v305_v4  ;;  %v116_v14 = vld [vmem:[%s498_s3 + $0x18] sm:$0xff]  ;;  %v311_v16 = vpack.c.bf16 %v29_v12, %v28_v11  ;;  %v117_v17 = vld [vmem:[%s498_s3 + $0x20] sm:$0xff]  ;;  %v118_v18 = vld [vmem:[%s498_s3 + $0x28] sm:$0xff] }
   0x5   :  { %307 = vmatprep.subr.bf16.mxu0 %v368_v3  ;;  %318 = vmatpush3.bf16.msra.mxu1 %v317_v13  ;;  %v320_v15 = vpack.c.bf16 %v116_v14, %v115_v10  ;;  %v30_v19 = vld [vmem:[%s496_s1 + $0x30] sm:$0xff]  ;;  %v31_v20 = vld [vmem:[%s496_s1 + $0x38] sm:$0xff] }
   0x6   :  { %319 = vmatprep.subr.bf16.mxu1 %v368_v3 }
   0x8   :  { %309 = vmatpush3.bf16.msra.mxu0 %v308_v7 }
   0x9   :  { %310 = vmatprep.subr.bf16.mxu0 %v368_v3 }
   0xa   :  { %10 = vsyncpa [#allocation3], 0  ;;  %321 = vmatpush3.bf16.msra.mxu1 %v320_v15  ;;  %v323_v21 = vpack.c.bf16 %v118_v18, %v117_v17  ;;  %v314_v22 = vpack.c.bf16 %v31_v20, %v30_v19  ;;  %v119_v23 = vld [vmem:[%s498_s3 + $0x30] sm:$0xff]  ;;  %v120_v24 = vld [vmem:[%s498_s3 + $0x38] sm:$0xff]  ;;  %vm38_vm1 = vcmask 523264   ;;  %s371_s20 = smov [#allocation2]  }
   0xb   :  { %322 = vmatprep.subr.bf16.mxu1 %v368_v3  ;;  %v326_v25 = vpack.c.bf16 %v120_v24, %v119_v23  ;;  %v23_v26 = vld [vmem:[%s495_s0] sm:$0xff]  ;;  %v122_v28 = vld [vmem:[%s498_s3 + $0x48] sm:$0xff]  ;;  %v123_v30 = vld [vmem:[%s498_s3 + $0x50] sm:$0xff]  ;;  %s213_s21 = sshll.u32 %s371_s20, 4  ;;  %vm205_vm2 = vcmask 130048   ;;  %s214_s21 = int_to_ptr.vmem [resolvable:$true] %s213_s21 }
   0xc   :  { %312 = vmatpush3.bf16.msra.mxu0 %v311_v16  ;;  %v121_v27 = vld [vmem:[%s498_s3 + $0x40] sm:$0xff]  ;;  %v124_v31 = vld [vmem:[%s498_s3 + $0x58] sm:$0xff]  ;;  %v126_v34 = vld [vmem:[%s498_s3 + $0x68] sm:$0xff]  ;;  %p349_p1 = scmp.lt.s32.totalorder %s214_s21, %s214_s21 }
   0xd   :  { %313 = vmatprep.subr.bf16.mxu0 %v368_v3  ;;  %v329_v29 = vpack.c.bf16 %v122_v28, %v121_v27  ;;  %v332_v32 = vpack.c.bf16 %v124_v31, %v123_v30  ;;  %v125_v33 = vld [vmem:[%s498_s3 + $0x60] sm:$0xff]  ;;  %v127_v36 = vld [vmem:[%s498_s3 + $0x70] sm:$0xff]  ;;  %v128_v37 = vld [vmem:[%s498_s3 + $0x78] sm:$0xff]  ;;  %s344_s3 = scalar_lea.vmem %s214_s21, 128 }
   0xe   :  { %324 = vmatpush3.bf16.msra.mxu1 %v323_v21  ;;  %v335_v35 = vpack.c.bf16 %v126_v34, %v125_v33  ;;  %v338_v38 = vpack.c.bf16 %v128_v37, %v127_v36  ;;  %v221_v39 = vld [vmem:[%s497_s2] ss:$0 sm:$0xff]  ;;  %p345_p0 = scmp.ne.s32.totalorder %s214_s21, %s344_s3  ;;  %p350_p2 = scmp.lt.s32.totalorder %s344_s3, %s344_s3 }
   0xf   :  { %325 = vmatprep.subr.bf16.mxu1 %v368_v3  ;;  %v223_v44 = vld [vmem:[%s499_s4] ss:$0 sm:$0xff] }
  0x10   :  { %315 = vmatpush3.bf16.msra.mxu0 %v314_v22  ;;  %p351_p3 = por %p350_p2, %p349_p1 }
  0x12   :  { %327 = vmatpush3.bf16.msra.mxu1 %v326_v25  ;;  %p352_p4 = pnand %p351_p3, %p345_p0 }
  0x13   :  { %267 = vmatmul.mubr.msk.f32.vlgmr.msra.gmra.mrb[0].mxu0 %vm38_vm1, %v23_v26  ;;  %328 = vmatprep.subr.bf16.mxu1 %v368_v3 }
  0x16   :  { %330 = vmatpush3.bf16.msra.mxu1 %v329_v29 }
  0x17   :  { %331 = vmatprep.subr.bf16.mxu1 %v368_v3 }
  0x1a   :  { %333 = vmatpush3.bf16.msra.mxu1 %v332_v32 }
  0x1b   :  { %334 = vmatprep.subr.bf16.mxu1 %v368_v3 }
  0x1e   :  { %336 = vmatpush3.bf16.msra.mxu1 %v335_v35 }
  0x1f   :  { %337 = vmatprep.subr.bf16.mxu1 %v368_v3 }
  0x22   :  { %339 = vmatpush3.bf16.msra.mxu1 %v338_v38 }
  0xe6   :  { %v108_v40 = vpop.f32.mrb[0].mxu0 }
  0xe7   :  { %v109_v41 = vadd.f32 %v221_v39, %v108_v40  ;;  %v268_v42 = vpop.f32.mrb[1].mxu0 }
  0xe9   :  { %v112_v43 = vmax.f32 %v109_v41, 0.0 }
  0xeb   :  { %302 = vmatmul.mubr.f32.vlgmr.msra.gmra.mrb[0].mxu1 %v112_v43 }
 0x1be   :  { %v201_v45 = vpop.f32.mrb[0].mxu1 }
 0x1bf   :  { %v202_v46 = vadd.f32 %v223_v44, %v201_v45  ;;  %v303_v47 = vpop.f32.mrb[1].mxu1 }
 0x1c1   :  { %206 = vst.msk [vmem:[#allocation2] sm:$0xff] %vm205_vm2, %v202_v46 }
 0x1c2   :  { %355 = shalt.err (!%p352_p4)
}
 0x1c3   :  { %s356_s23 = scalar_lea.hbm %s500_s5, 128 }
 0x1c4   :  { %p357_p5 = scmp.ne.s32.totalorder %s500_s5, %s356_s23  ;;  %p360_p6 = scmp.lt.u32.totalorder %s356_s23, %s500_s5 }
 0x1c6   :  { %p362_p7 = pnand %p360_p6, %p357_p5 }
 0x1c8   :  { %365 = shalt.err (!%p362_p7)
}
 0x1c9   :  { %216 = dma.vmem_to_hbm [thread:$0]  %s214_s21, 128, %s500_s5, [#allocation3]  }
 0x1ca   :  { %366 = dma.done.wait [#allocation3], 128  }
 0x1cb   :  { %367 = vsyncadd [#allocation3], 4294967168 }
 0x1cc   :  { %220 = vsyncpa [#allocation3], 1 }

</bundles_post_ra>
